<compile_context>
chip_gen: v5e
topology: v5e:2x2
jax: 0.10.0
libtpu: 0.0.40
codegen_flags: <defaults>
</compile_context>

<pallas_src>
import functools

import jax
import jax.numpy as jnp
from jax.experimental import pallas as pl
from jax.experimental.pallas import tpu as pltpu


# ---------------------------------------------------------------------------
# Synthetic Efunc / Qfunc
# TODO(synk): Efunc/Qfunc are undefined in the source module; deterministic
#             smooth stand-ins (9-vectors of t) are used here.
# ---------------------------------------------------------------------------
def Efunc(t):
    idx = jnp.arange(9, dtype=jnp.float32)
    return jnp.sin(t + 0.3 * idx).astype(jnp.float32)


def Qfunc(t):
    idx = jnp.arange(9, dtype=jnp.float32)
    return jnp.cos(0.5 * t + 0.2 * idx + 0.1).astype(jnp.float32)


# ---------------------------------------------------------------------------
# Packed-parameter layout (static, dh-independent; requires dh <= 117).
# ---------------------------------------------------------------------------
K_PAD = 128        # padded input feature width (dh + 11 <= 128)
OUT_PAD = 128      # packed output lanes: hRHS in 0..dh-1, thetaRHS in lane dh

# net: (K -> 128 -> 256 -> 256 -> 128 -> dh), packed into one (896, 256) slab.
_NET_FIN  = (K_PAD, 128, 256, 256, 128)
_NET_FOUT = (128, 256, 256, 128, OUT_PAD)     # last layer padded to 128 lanes
_NET_ROW  = (0, 128, 256, 512, 768)
NET_ROWS, NET_COLS = 896, 256

# netornt: (K -> 32 -> 64 -> 32 -> 1), all widths padded to 128 lanes,
# packed into one (512, 128) slab.
_ORN_FIN  = (K_PAD, 128, 128, 128)
_ORN_FOUT = (128, 128, 128, 128)
_ORN_ROW  = (0, 128, 256, 384)
ORN_ROWS, ORN_COLS = 512, 128

# bias slab (f32): one 8-aligned row per layer (net rows 0..32, ornt rows 40..64)
_NET_BROW = (0, 8, 16, 24, 32)
_ORN_BROW = (40, 48, 56, 64)
B_ROWS, B_COLS = 72, 256


# ---------------------------------------------------------------------------
# Pallas kernel: both MLP chains + residual (-alpha * state), packed output.
# ---------------------------------------------------------------------------
def _ode_mlp_kernel(alpha, x_ref, z_ref, y_ref, wn_ref, wo_ref, b_ref, out_ref):
    def dense(act_f32, w_ref, row0, fin, fout, brow, relu):
        w = w_ref[row0:row0 + fin, 0:fout]                       # bf16 static slice
        o = jnp.dot(act_f32.astype(jnp.bfloat16), w,
                    preferred_element_type=jnp.float32)
        o = o + b_ref[brow:brow + 1, 0:fout]                     # f32 bias row
        return jnp.maximum(o, 0.0) if relu else o

    # net: yE1 -> hRHS (lanes 0..dh-1 of the packed output, rest zero)
    x = x_ref[...]
    for li in range(5):
        x = dense(x, wn_ref, _NET_ROW[li], _NET_FIN[li], _NET_FOUT[li],
                  _NET_BROW[li], relu=(li < 4))

    # netornt: yE2 -> thetaRHS (only lane dh nonzero)
    z = z_ref[...]
    for li in range(4):
        z = dense(z, wo_ref, _ORN_ROW[li], _ORN_FIN[li], _ORN_FOUT[li],
                  _ORN_BROW[li], relu=(li < 3))

    # y_ref is the zero-padded state [h, ornt, 0...]; one lane-dense store.
    out_ref[...] = x + z - alpha * y_ref[...]


def _run_packed(xin, zin, ypad, w_net, w_ornt, b_all, alpha, tile_b, grid_b):
    spec_feat = pl.BlockSpec((tile_b, K_PAD), lambda i: (i, 0))
    spec_y    = pl.BlockSpec((tile_b, OUT_PAD), lambda i: (i, 0))
    # Constant index_maps -> weight slabs stay resident in VMEM across the grid.
    spec_wn   = pl.BlockSpec((NET_ROWS, NET_COLS), lambda i: (0, 0))
    spec_wo   = pl.BlockSpec((ORN_ROWS, ORN_COLS), lambda i: (0, 0))
    spec_b    = pl.BlockSpec((B_ROWS, B_COLS), lambda i: (0, 0))
    out_spec  = pl.BlockSpec((tile_b, OUT_PAD), lambda i: (i, 0))

    return pl.pallas_call(
        functools.partial(_ode_mlp_kernel, alpha),
        out_shape=jax.ShapeDtypeStruct((grid_b * tile_b, OUT_PAD), jnp.float32),
        grid=(grid_b,),
        in_specs=[spec_feat, spec_feat, spec_y, spec_wn, spec_wo, spec_b],
        out_specs=out_spec,
        compiler_params=pltpu.CompilerParams(
            dimension_semantics=("parallel",)),
    )(xin, zin, ypad, w_net, w_ornt, b_all)


# ---------------------------------------------------------------------------
# Glue (trig / 3x3 rotation / concatenation) — vectorized over the batch,
# fused into the same jax.jit as the Pallas call.
# ---------------------------------------------------------------------------
def _build_features(t, y_batch, dh):
    """Builds yE1 / yE2 for a batch of states: each (B, dh+11) float32."""
    h = y_batch[:, :dh]                          # (B, dh)
    ornt = y_batch[:, dh]                        # (B,)
    sina = jnp.sin(ornt)[:, None]
    cosa = jnp.cos(ornt)[:, None]

    E3 = Efunc(t).reshape(3, 3)
    Q3 = Qfunc(t).reshape(3, 3)
    thetaQ = jnp.arctan2(Q3[0, 1], Q3[0, 0])     # arctan2(Q[1], Q[0])
    phase = -ornt / 2.0 + thetaQ                 # (B,)
    cp, sp = jnp.cos(phase), jnp.sin(phase)
    zero = jnp.zeros_like(cp)
    RQ = jnp.stack([jnp.stack([cp, -sp, zero], -1),
                    jnp.stack([sp,  cp, zero], -1),
                    jnp.stack([zero, zero, zero], -1)], axis=-2)   # (B, 3, 3)

    E1 = jnp.einsum('bki,kl,blj->bij', RQ, E3, RQ).reshape(-1, 9)  # RQ^T E RQ
    E2 = (Q3 @ E3 @ Q3.T).reshape(1, 9)
    E2 = jnp.broadcast_to(E2, (y_batch.shape[0], 9))

    yE1 = jnp.concatenate([h, sina, cosa, E1], axis=-1)
    yE2 = jnp.concatenate([h, sina, cosa, E2], axis=-1)
    return yE1.astype(jnp.float32), yE2.astype(jnp.float32)


def _round_up(x, m):
    return (x + m - 1) // m * m


@functools.partial(jax.jit, static_argnames=("dh", "alpha"))
def ode_sin_forward_batch(t, y_batch, w_net, w_ornt, b_all, *, dh, alpha):
    """Batched ODEsin RHS: y_batch (B, dh+1) -> RHS (B, dh+1)."""
    B = y_batch.shape[0]
    K = dh + 11
    yE1, yE2 = _build_features(t, y_batch, dh)

    if B >= 128:
        tile_b = 128
        b_pad = _round_up(B, 128)
    else:
        b_pad = _round_up(B, 8)
        tile_b = b_pad
    grid_b = b_pad // tile_b

    xin = jnp.zeros((b_pad, K_PAD), jnp.float32).at[:B, :K].set(yE1)
    zin = jnp.zeros((b_pad, K_PAD), jnp.float32).at[:B, :K].set(yE2)
    ypad = jnp.zeros((b_pad, OUT_PAD), jnp.float32).at[:B, :dh + 1].set(y_batch)

    out = _run_packed(xin, zin, ypad, w_net, w_ornt, b_all, alpha, tile_b, grid_b)
    return out[:B, :dh + 1]


def ode_sin_forward(t, y, w_net, w_ornt, b_all, *, dh, alpha):
    """Single-state forward matching the PyTorch module's signature."""
    return ode_sin_forward_batch(t, y[None, :], w_net, w_ornt, b_all,
                                 dh=dh, alpha=alpha)[0]


# ---------------------------------------------------------------------------
# Parameter init (nn.init.normal_(std=0.1), bias=0) and slab packing.
# ---------------------------------------------------------------------------
def init_params(key, dh):
    K = dh + 11
    net_dims = [(K, 128), (128, 256), (256, 256), (256, 128), (128, dh)]
    ornt_dims = [(K, 32), (32, 64), (64, 32), (32, 1)]
    keys = jax.random.split(key, len(net_dims) + len(ornt_dims))
    net_params, ornt_params = [], []
    for k, (fi, fo) in zip(keys[:len(net_dims)], net_dims):
        net_params.append((0.1 * jax.random.normal(k, (fi, fo), jnp.float32),
                           jnp.zeros((fo,), jnp.float32)))
    for k, (fi, fo) in zip(keys[len(net_dims):], ornt_dims):
        ornt_params.append((0.1 * jax.random.normal(k, (fi, fo), jnp.float32),
                            jnp.zeros((fo,), jnp.float32)))
    return net_params, ornt_params


def pack_params(net_params, ornt_params, dh):
    """Packs all weights into two bf16 slabs + one f32 bias slab (lane/sublane
    aligned, padded once at init so the kernel only does static aligned slices)."""
    assert dh + 11 <= K_PAD and dh + 1 <= OUT_PAD, "dh too large for packing"

    w_net = jnp.zeros((NET_ROWS, NET_COLS), jnp.float32)
    b_all = jnp.zeros((B_ROWS, B_COLS), jnp.float32)
    for li, (w, b) in enumerate(net_params):
        fi, fo = w.shape
        w_net = w_net.at[_NET_ROW[li]:_NET_ROW[li] + fi, :fo].set(w)
        b_all = b_all.at[_NET_BROW[li], :fo].set(b)

    w_ornt = jnp.zeros((ORN_ROWS, ORN_COLS), jnp.float32)
    for li, (w, b) in enumerate(ornt_params):
        fi, fo = w.shape
        if li == len(ornt_params) - 1:
            # final 1-wide layer: place its single column at lane `dh`
            w_ornt = w_ornt.at[_ORN_ROW[li]:_ORN_ROW[li] + fi, dh:dh + 1].set(w)
            b_all = b_all.at[_ORN_BROW[li], dh:dh + 1].set(b)
        else:
            w_ornt = w_ornt.at[_ORN_ROW[li]:_ORN_ROW[li] + fi, :fo].set(w)
            b_all = b_all.at[_ORN_BROW[li], :fo].set(b)

    return w_net.astype(jnp.bfloat16), w_ornt.astype(jnp.bfloat16), b_all


# ---------------------------------------------------------------------------
# Pure-JAX reference (same bf16-rounded weights) for a sanity check.
# ---------------------------------------------------------------------------
def reference_forward_batch(t, y_batch, net_params, ornt_params, dh, alpha):
    yE1, yE2 = _build_features(t, y_batch, dh)

    def mlp(x, layers):
        n = len(layers)
        for i, (w, b) in enumerate(layers):
            x = x @ w.astype(jnp.bfloat16).astype(jnp.float32) + b
            if i < n - 1:
                x = jnp.maximum(x, 0.0)
        return x

    h = y_batch[:, :dh]
    ornt_col = y_batch[:, dh:dh + 1]
    hrhs = mlp(yE1, net_params) - alpha * h
    trhs = mlp(yE2, ornt_params) - alpha * ornt_col
    return jnp.concatenate([hrhs, trhs], axis=-1)


if __name__ == "__main__":
    dh = 32
    alpha = 0.1
    B = 16                                    # small batch of independent states

    key = jax.random.PRNGKey(0)
    kp, ky = jax.random.split(key)
    net_params, ornt_params = init_params(kp, dh)
    w_net, w_ornt, b_all = pack_params(net_params, ornt_params, dh)

    y = jax.random.normal(ky, (B, dh + 1), dtype=jnp.float32)
    t = jnp.float32(0.5)

    rhs = ode_sin_forward_batch(t, y, w_net, w_ornt, b_all, dh=dh, alpha=alpha)
    rhs = jax.block_until_ready(rhs)

    assert rhs.shape == (B, dh + 1) and rhs.dtype == jnp.float32
    ref = reference_forward_batch(t, y, net_params, ornt_params, dh, alpha)
    err = float(jnp.max(jnp.abs(rhs - ref)))
    assert bool(jnp.isfinite(rhs).all()) and err < 5e-2, f"max abs err {err}"
    print("KERNEL_OK")
</pallas_src>

<mosaic_0001>
module attributes {stable_mosaic.version = 11 : i64} {
  func.func @_ode_mlp_kernel(%arg0: i32, %arg1: memref<16x128xf32, #tpu.memory_space<vmem>>, %arg2: memref<16x128xf32, #tpu.memory_space<vmem>>, %arg3: memref<16x128xf32, #tpu.memory_space<vmem>>, %arg4: memref<896x256xbf16, #tpu.memory_space<vmem>>, %arg5: memref<512x128xbf16, #tpu.memory_space<vmem>>, %arg6: memref<72x256xf32, #tpu.memory_space<vmem>>, %arg7: memref<16x128xf32, #tpu.memory_space<vmem>>) attributes {dimension_semantics = [#tpu.dimension_semantics<parallel>], iteration_bounds = array<i64: 1>, scalar_prefetch = 0 : i64, scratch_operands = 0 : i64, tpu.core_type = #tpu.core_type<tc>, window_params = [{transform_indices = @transform_0, window_bounds = array<i64: 16, 128>}, {transform_indices = @transform_1, window_bounds = array<i64: 16, 128>}, {transform_indices = @transform_2, window_bounds = array<i64: 16, 128>}, {pipeline_mode = #tpu.pipeline_mode<synchronous>, transform_indices = @transform_3, window_bounds = array<i64: 896, 256>}, {pipeline_mode = #tpu.pipeline_mode<synchronous>, transform_indices = @transform_4, window_bounds = array<i64: 512, 128>}, {pipeline_mode = #tpu.pipeline_mode<synchronous>, transform_indices = @transform_5, window_bounds = array<i64: 72, 256>}, {transform_indices = @transform_6, window_bounds = array<i64: 16, 128>}]} {
    %c0 = arith.constant 0 : index
    %c0_0 = arith.constant 0 : index
    %0 = vector.load %arg1[%c0, %c0_0] : memref<16x128xf32, #tpu.memory_space<vmem>>, vector<16x128xf32>
    %c0_1 = arith.constant 0 : index
    %c0_2 = arith.constant 0 : index
    %1 = vector.load %arg4[%c0_1, %c0_2] : memref<896x256xbf16, #tpu.memory_space<vmem>>, vector<128x128xbf16>
    %2 = arith.truncf %0 : vector<16x128xf32> to vector<16x128xbf16>
    %cst = arith.constant dense<0.000000e+00> : vector<16x128xf32>
    %3 = tpu.matmul %2, %1, %cst {dimension_numbers = #tpu.dot_dimension_numbers<[1], [0], [0], [1], [0, 0, 1, 1], [], []>} : vector<16x128xbf16>, vector<128x128xbf16>, vector<16x128xf32> -> vector<16x128xf32>
    %c0_3 = arith.constant 0 : index
    %c0_4 = arith.constant 0 : index
    %4 = vector.load %arg6[%c0_3, %c0_4] : memref<72x256xf32, #tpu.memory_space<vmem>>, vector<1x128xf32>
    %5 = vector.broadcast %4 : vector<1x128xf32> to vector<16x128xf32>
    %6 = arith.addf %3, %5 : vector<16x128xf32>
    %cst_5 = arith.constant 0.000000e+00 : f32
    %7 = vector.broadcast %cst_5 : f32 to vector<16x128xf32>
    %8 = arith.maximumf %6, %7 : vector<16x128xf32>
    %c128 = arith.constant 128 : index
    %c0_6 = arith.constant 0 : index
    %9 = vector.load %arg4[%c128, %c0_6] : memref<896x256xbf16, #tpu.memory_space<vmem>>, vector<128x256xbf16>
    %10 = arith.truncf %8 : vector<16x128xf32> to vector<16x128xbf16>
    %cst_7 = arith.constant dense<0.000000e+00> : vector<16x256xf32>
    %11 = tpu.matmul %10, %9, %cst_7 {dimension_numbers = #tpu.dot_dimension_numbers<[1], [0], [0], [1], [0, 0, 1, 1], [], []>} : vector<16x128xbf16>, vector<128x256xbf16>, vector<16x256xf32> -> vector<16x256xf32>
    %c8 = arith.constant 8 : index
    %c0_8 = arith.constant 0 : index
    %12 = vector.load %arg6[%c8, %c0_8] : memref<72x256xf32, #tpu.memory_space<vmem>>, vector<1x256xf32>
    %13 = vector.broadcast %12 : vector<1x256xf32> to vector<16x256xf32>
    %14 = arith.addf %11, %13 : vector<16x256xf32>
    %cst_9 = arith.constant 0.000000e+00 : f32
    %15 = vector.broadcast %cst_9 : f32 to vector<16x256xf32>
    %16 = arith.maximumf %14, %15 : vector<16x256xf32>
    %c256 = arith.constant 256 : index
    %c0_10 = arith.constant 0 : index
    %17 = vector.load %arg4[%c256, %c0_10] : memref<896x256xbf16, #tpu.memory_space<vmem>>, vector<256x256xbf16>
    %18 = arith.truncf %16 : vector<16x256xf32> to vector<16x256xbf16>
    %cst_11 = arith.constant dense<0.000000e+00> : vector<16x256xf32>
    %19 = tpu.matmul %18, %17, %cst_11 {dimension_numbers = #tpu.dot_dimension_numbers<[1], [0], [0], [1], [0, 0, 1, 1], [], []>} : vector<16x256xbf16>, vector<256x256xbf16>, vector<16x256xf32> -> vector<16x256xf32>
    %c16 = arith.constant 16 : index
    %c0_12 = arith.constant 0 : index
    %20 = vector.load %arg6[%c16, %c0_12] : memref<72x256xf32, #tpu.memory_space<vmem>>, vector<1x256xf32>
    %21 = vector.broadcast %20 : vector<1x256xf32> to vector<16x256xf32>
    %22 = arith.addf %19, %21 : vector<16x256xf32>
    %cst_13 = arith.constant 0.000000e+00 : f32
    %23 = vector.broadcast %cst_13 : f32 to vector<16x256xf32>
    %24 = arith.maximumf %22, %23 : vector<16x256xf32>
    %c512 = arith.constant 512 : index
    %c0_14 = arith.constant 0 : index
    %25 = vector.load %arg4[%c512, %c0_14] : memref<896x256xbf16, #tpu.memory_space<vmem>>, vector<256x128xbf16>
    %26 = arith.truncf %24 : vector<16x256xf32> to vector<16x256xbf16>
    %cst_15 = arith.constant dense<0.000000e+00> : vector<16x128xf32>
    %27 = tpu.matmul %26, %25, %cst_15 {dimension_numbers = #tpu.dot_dimension_numbers<[1], [0], [0], [1], [0, 0, 1, 1], [], []>} : vector<16x256xbf16>, vector<256x128xbf16>, vector<16x128xf32> -> vector<16x128xf32>
    %c24 = arith.constant 24 : index
    %c0_16 = arith.constant 0 : index
    %28 = vector.load %arg6[%c24, %c0_16] : memref<72x256xf32, #tpu.memory_space<vmem>>, vector<1x128xf32>
    %29 = vector.broadcast %28 : vector<1x128xf32> to vector<16x128xf32>
    %30 = arith.addf %27, %29 : vector<16x128xf32>
    %cst_17 = arith.constant 0.000000e+00 : f32
    %31 = vector.broadcast %cst_17 : f32 to vector<16x128xf32>
    %32 = arith.maximumf %30, %31 : vector<16x128xf32>
    %c768 = arith.constant 768 : index
    %c0_18 = arith.constant 0 : index
    %33 = vector.load %arg4[%c768, %c0_18] : memref<896x256xbf16, #tpu.memory_space<vmem>>, vector<128x128xbf16>
    %34 = arith.truncf %32 : vector<16x128xf32> to vector<16x128xbf16>
    %cst_19 = arith.constant dense<0.000000e+00> : vector<16x128xf32>
    %35 = tpu.matmul %34, %33, %cst_19 {dimension_numbers = #tpu.dot_dimension_numbers<[1], [0], [0], [1], [0, 0, 1, 1], [], []>} : vector<16x128xbf16>, vector<128x128xbf16>, vector<16x128xf32> -> vector<16x128xf32>
    %c32 = arith.constant 32 : index
    %c0_20 = arith.constant 0 : index
    %36 = vector.load %arg6[%c32, %c0_20] : memref<72x256xf32, #tpu.memory_space<vmem>>, vector<1x128xf32>
    %37 = vector.broadcast %36 : vector<1x128xf32> to vector<16x128xf32>
    %38 = arith.addf %35, %37 : vector<16x128xf32>
    %c0_21 = arith.constant 0 : index
    %c0_22 = arith.constant 0 : index
    %39 = vector.load %arg2[%c0_21, %c0_22] : memref<16x128xf32, #tpu.memory_space<vmem>>, vector<16x128xf32>
    %c0_23 = arith.constant 0 : index
    %c0_24 = arith.constant 0 : index
    %40 = vector.load %arg5[%c0_23, %c0_24] : memref<512x128xbf16, #tpu.memory_space<vmem>>, vector<128x128xbf16>
    %41 = arith.truncf %39 : vector<16x128xf32> to vector<16x128xbf16>
    %cst_25 = arith.constant dense<0.000000e+00> : vector<16x128xf32>
    %42 = tpu.matmul %41, %40, %cst_25 {dimension_numbers = #tpu.dot_dimension_numbers<[1], [0], [0], [1], [0, 0, 1, 1], [], []>} : vector<16x128xbf16>, vector<128x128xbf16>, vector<16x128xf32> -> vector<16x128xf32>
    %c40 = arith.constant 40 : index
    %c0_26 = arith.constant 0 : index
    %43 = vector.load %arg6[%c40, %c0_26] : memref<72x256xf32, #tpu.memory_space<vmem>>, vector<1x128xf32>
    %44 = vector.broadcast %43 : vector<1x128xf32> to vector<16x128xf32>
    %45 = arith.addf %42, %44 : vector<16x128xf32>
    %cst_27 = arith.constant 0.000000e+00 : f32
    %46 = vector.broadcast %cst_27 : f32 to vector<16x128xf32>
    %47 = arith.maximumf %45, %46 : vector<16x128xf32>
    %c128_28 = arith.constant 128 : index
    %c0_29 = arith.constant 0 : index
    %48 = vector.load %arg5[%c128_28, %c0_29] : memref<512x128xbf16, #tpu.memory_space<vmem>>, vector<128x128xbf16>
    %49 = arith.truncf %47 : vector<16x128xf32> to vector<16x128xbf16>
    %cst_30 = arith.constant dense<0.000000e+00> : vector<16x128xf32>
    %50 = tpu.matmul %49, %48, %cst_30 {dimension_numbers = #tpu.dot_dimension_numbers<[1], [0], [0], [1], [0, 0, 1, 1], [], []>} : vector<16x128xbf16>, vector<128x128xbf16>, vector<16x128xf32> -> vector<16x128xf32>
    %c48 = arith.constant 48 : index
    %c0_31 = arith.constant 0 : index
    %51 = vector.load %arg6[%c48, %c0_31] : memref<72x256xf32, #tpu.memory_space<vmem>>, vector<1x128xf32>
    %52 = vector.broadcast %51 : vector<1x128xf32> to vector<16x128xf32>
    %53 = arith.addf %50, %52 : vector<16x128xf32>
    %cst_32 = arith.constant 0.000000e+00 : f32
    %54 = vector.broadcast %cst_32 : f32 to vector<16x128xf32>
    %55 = arith.maximumf %53, %54 : vector<16x128xf32>
    %c256_33 = arith.constant 256 : index
    %c0_34 = arith.constant 0 : index
    %56 = vector.load %arg5[%c256_33, %c0_34] : memref<512x128xbf16, #tpu.memory_space<vmem>>, vector<128x128xbf16>
    %57 = arith.truncf %55 : vector<16x128xf32> to vector<16x128xbf16>
    %cst_35 = arith.constant dense<0.000000e+00> : vector<16x128xf32>
    %58 = tpu.matmul %57, %56, %cst_35 {dimension_numbers = #tpu.dot_dimension_numbers<[1], [0], [0], [1], [0, 0, 1, 1], [], []>} : vector<16x128xbf16>, vector<128x128xbf16>, vector<16x128xf32> -> vector<16x128xf32>
    %c56 = arith.constant 56 : index
    %c0_36 = arith.constant 0 : index
    %59 = vector.load %arg6[%c56, %c0_36] : memref<72x256xf32, #tpu.memory_space<vmem>>, vector<1x128xf32>
    %60 = vector.broadcast %59 : vector<1x128xf32> to vector<16x128xf32>
    %61 = arith.addf %58, %60 : vector<16x128xf32>
    %cst_37 = arith.constant 0.000000e+00 : f32
    %62 = vector.broadcast %cst_37 : f32 to vector<16x128xf32>
    %63 = arith.maximumf %61, %62 : vector<16x128xf32>
    %c384 = arith.constant 384 : index
    %c0_38 = arith.constant 0 : index
    %64 = vector.load %arg5[%c384, %c0_38] : memref<512x128xbf16, #tpu.memory_space<vmem>>, vector<128x128xbf16>
    %65 = arith.truncf %63 : vector<16x128xf32> to vector<16x128xbf16>
    %cst_39 = arith.constant dense<0.000000e+00> : vector<16x128xf32>
    %66 = tpu.matmul %65, %64, %cst_39 {dimension_numbers = #tpu.dot_dimension_numbers<[1], [0], [0], [1], [0, 0, 1, 1], [], []>} : vector<16x128xbf16>, vector<128x128xbf16>, vector<16x128xf32> -> vector<16x128xf32>
    %c64 = arith.constant 64 : index
    %c0_40 = arith.constant 0 : index
    %67 = vector.load %arg6[%c64, %c0_40] : memref<72x256xf32, #tpu.memory_space<vmem>>, vector<1x128xf32>
    %68 = vector.broadcast %67 : vector<1x128xf32> to vector<16x128xf32>
    %69 = arith.addf %66, %68 : vector<16x128xf32>
    %70 = arith.addf %38, %69 : vector<16x128xf32>
    %c0_41 = arith.constant 0 : index
    %c0_42 = arith.constant 0 : index
    %71 = vector.load %arg3[%c0_41, %c0_42] : memref<16x128xf32, #tpu.memory_space<vmem>>, vector<16x128xf32>
    %cst_43 = arith.constant 1.000000e-01 : f32
    %72 = vector.broadcast %cst_43 : f32 to vector<16x128xf32>
    %73 = arith.mulf %72, %71 : vector<16x128xf32>
    %74 = arith.subf %70, %73 : vector<16x128xf32>
    %c0_44 = arith.constant 0 : index
    %c0_45 = arith.constant 0 : index
    %75 = vector.load %arg7[%c0_44, %c0_45] : memref<16x128xf32, #tpu.memory_space<vmem>>, vector<16x128xf32>
    tpu.vector_store %arg7[%c0_44, %c0_45], %74 {strides = array<i32>} : memref<16x128xf32, #tpu.memory_space<vmem>>, vector<16x128xf32>,
    return
  }
  func.func @transform_0(%arg0: i32) -> (i32, i32) {
    %c0_i32 = arith.constant 0 : i32
    %c0_i32_0 = arith.constant 0 : i32
    return %arg0, %c0_i32 : i32, i32
  }
  func.func @transform_1(%arg0: i32) -> (i32, i32) {
    %c0_i32 = arith.constant 0 : i32
    %c0_i32_0 = arith.constant 0 : i32
    return %arg0, %c0_i32 : i32, i32
  }
  func.func @transform_2(%arg0: i32) -> (i32, i32) {
    %c0_i32 = arith.constant 0 : i32
    %c0_i32_0 = arith.constant 0 : i32
    return %arg0, %c0_i32 : i32, i32
  }
  func.func @transform_3(%arg0: i32) -> (i32, i32) {
    %c0_i32 = arith.constant 0 : i32
    %c0_i32_0 = arith.constant 0 : i32
    %c0_i32_1 = arith.constant 0 : i32
    return %c0_i32, %c0_i32_0 : i32, i32
  }
  func.func @transform_4(%arg0: i32) -> (i32, i32) {
    %c0_i32 = arith.constant 0 : i32
    %c0_i32_0 = arith.constant 0 : i32
    %c0_i32_1 = arith.constant 0 : i32
    return %c0_i32, %c0_i32_0 : i32, i32
  }
  func.func @transform_5(%arg0: i32) -> (i32, i32) {
    %c0_i32 = arith.constant 0 : i32
    %c0_i32_0 = arith.constant 0 : i32
    %c0_i32_1 = arith.constant 0 : i32
    return %c0_i32, %c0_i32_0 : i32, i32
  }
  func.func @transform_6(%arg0: i32) -> (i32, i32) {
    %c0_i32 = arith.constant 0 : i32
    %c0_i32_0 = arith.constant 0 : i32
    return %arg0, %c0_i32 : i32, i32
  }
}

</mosaic_0001>

<bundles_post_ra>
// kernel: ode_sin_forward_batch.1
= control target key start
LH: loop header
LB: loop body
LE: loop exit
PB: predicated region body
PF: predicated region fallthrough
CT: control target
= control target key end

     0   :  { %11 = vsyncpa [#allocation3], 0  ;;  %s1929_s0 = inlined_call_operand.vmem [shape: f32[16,128], index: 0, kind: input, shape index: {}]   ;;  %s1930_s1 = inlined_call_operand.vmem [shape: f32[16,128], index: 1, kind: input, shape index: {}]   ;;  %s1931_s2 = inlined_call_operand.vmem [shape: f32[16,128], index: 2, kind: input, shape index: {}]   ;;  %s1932_s3 = inlined_call_operand.hbm [shape: bf16[896,256], index: 3, kind: input, shape index: {}]   ;;  %s1933_s4 = inlined_call_operand.vmem [shape: bf16[512,128], index: 4, kind: input, shape index: {}]   ;;  %s1934_s5 = inlined_call_operand.vmem [shape: f32[72,256], index: 5, kind: input, shape index: {}]   ;;  %s1935_s6 = inlined_call_operand.hbm [shape: f32[16,128], index: 6, kind: output, shape index: {}]  }
   0x1   :  { %12 = vsyncpa [#allocation4], 0  ;;  %s23_s23 = sshll.u32 %s1932_s3, 4  ;;  %s1737_s24 = smov [#allocation2]   ;;  %s24_s23 = int_to_ptr.hbm [resolvable:$true] %s23_s23 }
   0x2   :  { %s25_s25 = sshll.u32 %s1737_s24, 4  ;;  %s1738_s26 = smov 128   ;;  %s26_s25 = int_to_ptr.vmem [resolvable:$true] %s25_s25 }
   0x3   :  { %s1739_s27 = smov 8  }
   0x4   :  { %31 = dma.hbm_to_vmem [thread:$0]  %s24_s23, 14336, %s26_s25, [#allocation3], %s1738_s26, %s1738_s26, %s1739_s27  }
   0x5   :  { %1733 = dma.done.wait [#allocation3], 14336  }
   0x6   :  { %1734 = vsyncadd [#allocation3], 4294952960  ;;  %v1149_v0 = vld [vmem:[#allocation2 + $0x70] sm:$0xf]  ;;  %v1576_v1 = vld [vmem:[#allocation2 + $0x74] sm:$0xf0] }
   0x7   :  { %v1145_v2 = vld [vmem:[#allocation2 + $0x60] sm:$0xf]  ;;  %v1150_v3 = vor.u32 %v1576_v1, %v1149_v0  ;;  %v1575_v4 = vld [vmem:[#allocation2 + $0x64] sm:$0xf0]  ;;  %v1141_v6 = vld [vmem:[#allocation2 + $0x50] sm:$0xf] }
   0x8   :  { %v1146_v5 = vor.u32 %v1575_v4, %v1145_v2  ;;  %v1574_v7 = vld [vmem:[#allocation2 + $0x54] sm:$0xf0]  ;;  %v1137_v8 = vld [vmem:[#allocation2 + $0x40] sm:$0xf]  ;;  %v1210_v9 = vld [vmem:[#allocation2 + $0xf0] sm:$0xf] }
   0x9   :  { %108 = vmatpush.bf16.msra.mxu0 %v1150_v3  ;;  %v1592_v10 = vld [vmem:[#allocation2 + $0xf4] sm:$0xf0]  ;;  %v1591_v11 = vld [vmem:[#allocation2 + $0xf4] sm:$0xf]  ;;  %v1142_v12 = vor.u32 %v1574_v7, %v1141_v6  ;;  %v1212_v14 = vld [vmem:[#allocation2 + $0xf8] sm:$0xf0] }
   0xa   :  { %v1211_v13 = vor.u32 %v1592_v10, %v1210_v9  ;;  %v1202_v15 = vld [vmem:[#allocation2 + $0xe0] sm:$0xf]  ;;  %v1590_v16 = vld [vmem:[#allocation2 + $0xe4] sm:$0xf0]  ;;  %v1215_v18 = vor.u32 %v1591_v11, %v1212_v14  ;;  %v1589_v19 = vld [vmem:[#allocation2 + $0xe4] sm:$0xf] }
   0xb   :  { %v1573_v17 = vld [vmem:[#allocation2 + $0x44] sm:$0xf0]  ;;  %v1204_v20 = vld [vmem:[#allocation2 + $0xe8] sm:$0xf0]  ;;  %v1203_v21 = vor.u32 %v1590_v16, %v1202_v15  ;;  %v1194_v23 = vld [vmem:[#allocation2 + $0xd0] sm:$0xf] }
   0xc   :  { %228 = vmatpush.bf16.msra.mxu1 %v1211_v13  ;;  %242 = vmatpush.bf16.msra.mxu2 %v1215_v18  ;;  %v1207_v22 = vor.u32 %v1589_v19, %v1204_v20  ;;  %v1588_v24 = vld [vmem:[#allocation2 + $0xd4] sm:$0xf0]  ;;  %v1138_v25 = vor.u32 %v1573_v17, %v1137_v8  ;;  %v1587_v26 = vld [vmem:[#allocation2 + $0xd4] sm:$0xf]  ;;  %v1196_v27 = vld [vmem:[#allocation2 + $0xd8] sm:$0xf0] }
   0xd   :  { %109 = vmatpush.bf16.msra.mxu0 %v1146_v5  ;;  %v1133_v28 = vld [vmem:[#allocation2 + $0x30] sm:$0xf]  ;;  %v1572_v29 = vld [vmem:[#allocation2 + $0x34] sm:$0xf0]  ;;  %v1195_v30 = vor.u32 %v1588_v24, %v1194_v23  ;;  %v1199_v31 = vor.u32 %v1587_v26, %v1196_v27  ;;  %v1186_v32 = vld [vmem:[#allocation2 + $0xc0] sm:$0xf] }
   0xe   :  { %v1586_v33 = vld [vmem:[#allocation2 + $0xc4] sm:$0xf0]  ;;  %v1134_v34 = vor.u32 %v1572_v29, %v1133_v28  ;;  %v1585_v35 = vld [vmem:[#allocation2 + $0xc4] sm:$0xf]  ;;  %v1188_v36 = vld [vmem:[#allocation2 + $0xc8] sm:$0xf0] }
   0xf   :  { %v1129_v37 = vld [vmem:[#allocation2 + $0x20] sm:$0xf]  ;;  %v1571_v38 = vld [vmem:[#allocation2 + $0x24] sm:$0xf0]  ;;  %v1187_v39 = vor.u32 %v1586_v33, %v1186_v32  ;;  %v1191_v40 = vor.u32 %v1585_v35, %v1188_v36  ;;  %v1125_v42 = vld [vmem:[#allocation2 + $0x10] sm:$0xf] }
  0x10   :  { %229 = vmatpush.bf16.msra.mxu1 %v1203_v21  ;;  %243 = vmatpush.bf16.msra.mxu2 %v1207_v22  ;;  %v1130_v41 = vor.u32 %v1571_v38, %v1129_v37  ;;  %v1570_v43 = vld [vmem:[#allocation2 + $0x14] sm:$0xf0]  ;;  %v1121_v45 = vld [vmem:[#allocation2] sm:$0xf]  ;;  %v1569_v46 = vld [vmem:[#allocation2 + $0x4] sm:$0xf0] }
  0x11   :  { %110 = vmatpush.bf16.msra.mxu0 %v1142_v12  ;;  %v1126_v44 = vor.u32 %v1570_v43, %v1125_v42  ;;  %v1122_v47 = vor.u32 %v1569_v46, %v1121_v45  ;;  %v40_v48 = vld [vmem:[%s1929_s0] sm:$0xff]  ;;  %v41_v49 = vld [vmem:[%s1929_s0 + $0x8] sm:$0xff]  ;;  %v1178_v51 = vld [vmem:[#allocation2 + $0xb0] sm:$0xf]  ;;  %s1106_s23 = sshll.u32 %s1935_s6, 4  ;;  %s1107_s23 = int_to_ptr.hbm [resolvable:$true] %s1106_s23 }
  0x12   :  { %v58_v50 = vpack.c.bf16 %v41_v49, %v40_v48  ;;  %v1584_v52 = vld [vmem:[#allocation2 + $0xb4] sm:$0xf0]  ;;  %v1583_v53 = vld [vmem:[#allocation2 + $0xb4] sm:$0xf]  ;;  %v1180_v55 = vld [vmem:[#allocation2 + $0xb8] sm:$0xf0] }
  0x13   :  { %v1179_v54 = vor.u32 %v1584_v52, %v1178_v51  ;;  %v1183_v56 = vor.u32 %v1583_v53, %v1180_v55  ;;  %v1170_v57 = vld [vmem:[#allocation2 + $0xa0] sm:$0xf]  ;;  %v1582_v58 = vld [vmem:[#allocation2 + $0xa4] sm:$0xf0]  ;;  %v1581_v59 = vld [vmem:[#allocation2 + $0xa4] sm:$0xf] }
  0x14   :  { %230 = vmatpush.bf16.msra.mxu1 %v1195_v30  ;;  %244 = vmatpush.bf16.msra.mxu2 %v1199_v31  ;;  %v1171_v60 = vor.u32 %v1582_v58, %v1170_v57  ;;  %v1172_v61 = vld [vmem:[#allocation2 + $0xa8] sm:$0xf0]  ;;  %v1162_v63 = vld [vmem:[#allocation2 + $0x90] sm:$0xf]  ;;  %v1580_v0 = vld [vmem:[#allocation2 + $0x94] sm:$0xf0] }
  0x15   :  { %111 = vmatpush.bf16.msra.mxu0 %v1138_v25  ;;  %v1175_v62 = vor.u32 %v1581_v59, %v1172_v61  ;;  %v1579_v1 = vld [vmem:[#allocation2 + $0x94] sm:$0xf]  ;;  %v1163_v2 = vor.u32 %v1580_v0, %v1162_v63  ;;  %v1164_v3 = vld [vmem:[#allocation2 + $0x98] sm:$0xf0]  ;;  %v1154_v5 = vld [vmem:[#allocation2 + $0x80] sm:$0xf] }
  0x16   :  { %v1167_v4 = vor.u32 %v1579_v1, %v1164_v3  ;;  %v1578_v6 = vld [vmem:[#allocation2 + $0x84] sm:$0xf0]  ;;  %v1577_v7 = vld [vmem:[#allocation2 + $0x84] sm:$0xf]  ;;  %v1156_v9 = vld [vmem:[#allocation2 + $0x88] sm:$0xf0] }
  0x17   :  { %v1155_v8 = vor.u32 %v1578_v6, %v1154_v5  ;;  %v1159_v10 = vor.u32 %v1577_v7, %v1156_v9  ;;  %v1623_v11 = vld [vmem:[#allocation2 + $0x1f4] sm:$0xf]  ;;  %v1341_v12 = vld [vmem:[#allocation2 + $0x1f8] sm:$0xf0]  ;;  %v1621_v13 = vld [vmem:[#allocation2 + $0x1e4] sm:$0xf] }
  0x18   :  { %231 = vmatpush.bf16.msra.mxu1 %v1187_v39  ;;  %245 = vmatpush.bf16.msra.mxu2 %v1191_v40  ;;  %v1344_v14 = vor.u32 %v1623_v11, %v1341_v12  ;;  %v1333_v15 = vld [vmem:[#allocation2 + $0x1e8] sm:$0xf0]  ;;  %v1275_v16 = vld [vmem:[#allocation2 + $0x170] sm:$0xf]  ;;  %v1608_v17 = vld [vmem:[#allocation2 + $0x174] sm:$0xf0] }
  0x19   :  { %112 = vmatpush.bf16.msra.mxu0 %v1134_v34  ;;  %v1276_v18 = vor.u32 %v1608_v17, %v1275_v16  ;;  %v1607_v19 = vld [vmem:[#allocation2 + $0x174] sm:$0xf]  ;;  %v1277_v20 = vld [vmem:[#allocation2 + $0x178] sm:$0xf0]  ;;  %v1336_v21 = vor.u32 %v1621_v13, %v1333_v15  ;;  %v1267_v24 = vld [vmem:[#allocation2 + $0x160] sm:$0xf] }
  0x1a   :  { %v1280_v22 = vor.u32 %v1607_v19, %v1277_v20  ;;  %v1619_v23 = vld [vmem:[#allocation2 + $0x1d4] sm:$0xf]  ;;  %v1606_v25 = vld [vmem:[#allocation2 + $0x164] sm:$0xf0]  ;;  %v1325_v26 = vld [vmem:[#allocation2 + $0x1d8] sm:$0xf0] }
  0x1b   :  { %461 = vmatpush.bf16.msra.mxu3 %v1276_v18  ;;  %v1268_v27 = vor.u32 %v1606_v25, %v1267_v24  ;;  %v1605_v28 = vld [vmem:[#allocation2 + $0x164] sm:$0xf]  ;;  %v1269_v29 = vld [vmem:[#allocation2 + $0x168] sm:$0xf0]  ;;  %v1339_v31 = vld [vmem:[#allocation2 + $0x1f0] sm:$0xf]  ;;  %v1328_v37 = vor.u32 %v1619_v23, %v1325_v26 }
  0x1c   :  { %232 = vmatpush.bf16.msra.mxu1 %v1179_v54  ;;  %246 = vmatpush.bf16.msra.mxu2 %v1183_v56  ;;  %v1272_v30 = vor.u32 %v1605_v28, %v1269_v29  ;;  %v1624_v32 = vld [vmem:[#allocation2 + $0x1f4] sm:$0xf0]  ;;  %v1259_v34 = vld [vmem:[#allocation2 + $0x150] sm:$0xf]  ;;  %v1603_v36 = vld [vmem:[#allocation2 + $0x154] sm:$0xf] }
  0x1d   :  { %113 = vmatpush.bf16.msra.mxu0 %v1130_v41  ;;  %v1340_v33 = vor.u32 %v1624_v32, %v1339_v31  ;;  %v1604_v35 = vld [vmem:[#allocation2 + $0x154] sm:$0xf0]  ;;  %v1617_v38 = vld [vmem:[#allocation2 + $0x1c4] sm:$0xf]  ;;  %v1261_v39 = vld [vmem:[#allocation2 + $0x158] sm:$0xf0] }
  0x1e   :  { %v1317_v40 = vld [vmem:[#allocation2 + $0x1c8] sm:$0xf0]  ;;  %v1260_v41 = vor.u32 %v1604_v35, %v1259_v34  ;;  %v1331_v42 = vld [vmem:[#allocation2 + $0x1e0] sm:$0xf]  ;;  %v1622_v43 = vld [vmem:[#allocation2 + $0x1e4] sm:$0xf0] }
  0x1f   :  { %462 = vmatpush.bf16.msra.mxu3 %v1268_v27  ;;  %v1332_v45 = vor.u32 %v1622_v43, %v1331_v42  ;;  %v1251_v46 = vld [vmem:[#allocation2 + $0x140] sm:$0xf]  ;;  %v1601_v48 = vld [vmem:[#allocation2 + $0x144] sm:$0xf]  ;;  %v1253_v49 = vld [vmem:[#allocation2 + $0x148] sm:$0xf0]  ;;  %v1320_v51 = vor.u32 %v1617_v38, %v1317_v40 }
  0x20   :  { %233 = vmatpush.bf16.msra.mxu1 %v1171_v60  ;;  %247 = vmatpush.bf16.msra.mxu2 %v1175_v62  ;;  %v1620_v52 = vld [vmem:[#allocation2 + $0x1d4] sm:$0xf0]  ;;  %v1615_v53 = vld [vmem:[#allocation2 + $0x1b4] sm:$0xf]  ;;  %v1309_v54 = vld [vmem:[#allocation2 + $0x1b8] sm:$0xf0]  ;;  %v1256_v57 = vor.u32 %v1601_v48, %v1253_v49 }
  0x21   :  { %114 = vmatpush.bf16.msra.mxu0 %v1126_v44  ;;  %v1264_v44 = vor.u32 %v1603_v36, %v1261_v39  ;;  %v1312_v58 = vor.u32 %v1615_v53, %v1309_v54  ;;  %v1613_v59 = vld [vmem:[#allocation2 + $0x1a4] sm:$0xf]  ;;  %v1301_v60 = vld [vmem:[#allocation2 + $0x1a8] sm:$0xf0]  ;;  %v59_v63 = vld [vmem:[%s1934_s5] ss:$0 sm:$0xff] }
  0x22   :  { %v1304_v62 = vor.u32 %v1613_v59, %v1301_v60  ;;  %v1243_v6 = vld [vmem:[#allocation2 + $0x130] sm:$0xf]  ;;  %v1600_v7 = vld [vmem:[#allocation2 + $0x134] sm:$0xf0]  ;;  %v1611_v11 = vld [vmem:[#allocation2 + $0x194] sm:$0xf] }
  0x23   :  { %463 = vmatpush.bf16.msra.mxu3 %v1260_v41  ;;  %v1244_v9 = vor.u32 %v1600_v7, %v1243_v6  ;;  %v1293_v12 = vld [vmem:[#allocation2 + $0x198] sm:$0xf0]  ;;  %v1315_v15 = vld [vmem:[#allocation2 + $0x1c0] sm:$0xf]  ;;  %v1618_v16 = vld [vmem:[#allocation2 + $0x1c4] sm:$0xf0] }
  0x24   :  { %234 = vmatpush.bf16.msra.mxu1 %v1163_v2  ;;  %248 = vmatpush.bf16.msra.mxu2 %v1167_v4  ;;  %v1316_v17 = vor.u32 %v1618_v16, %v1315_v15  ;;  %v1235_v18 = vld [vmem:[#allocation2 + $0x120] sm:$0xf]  ;;  %v1598_v19 = vld [vmem:[#allocation2 + $0x124] sm:$0xf0]  ;;  %v1597_v20 = vld [vmem:[#allocation2 + $0x124] sm:$0xf] }
  0x25   :  { %115 = vmatpush.bf16.msra.mxu0 %v1122_v47  ;;  %v1602_v47 = vld [vmem:[#allocation2 + $0x144] sm:$0xf0]  ;;  %v1609_v23 = vld [vmem:[#allocation2 + $0x184] sm:$0xf]  ;;  %v1285_v24 = vld [vmem:[#allocation2 + $0x188] sm:$0xf0] }
  0x26   :  { %v1252_v55 = vor.u32 %v1602_v47, %v1251_v46  ;;  %v1288_v26 = vor.u32 %v1609_v23, %v1285_v24  ;;  %v1307_v27 = vld [vmem:[#allocation2 + $0x1b0] sm:$0xf]  ;;  %v1616_v28 = vld [vmem:[#allocation2 + $0x1b4] sm:$0xf0]  ;;  %v1229_v35 = vld [vmem:[#allocation2 + $0x118] sm:$0xf0] }
  0x27   :  { %v1308_v29 = vor.u32 %v1616_v28, %v1307_v27  ;;  %v1227_v31 = vld [vmem:[#allocation2 + $0x110] sm:$0xf]  ;;  %v1596_v32 = vld [vmem:[#allocation2 + $0x114] sm:$0xf0]  ;;  %v1614_v38 = vld [vmem:[#allocation2 + $0x1a4] sm:$0xf0] }
  0x28   :  { %116 = vmatmul.bf16.vlgmr.msra.gmra.mxu0 %v58_v50  ;;  %235 = vmatpush.bf16.msra.mxu1 %v1155_v8  ;;  %v1323_v50 = vld [vmem:[#allocation2 + $0x1d0] sm:$0xf]  ;;  %v1599_v8 = vld [vmem:[#allocation2 + $0x134] sm:$0xf]  ;;  %v1228_v34 = vor.u32 %v1596_v32, %v1227_v31  ;;  %v1219_v41 = vld [vmem:[#allocation2 + $0x100] sm:$0xf] }
  0x29   :  { %249 = vmatpush.bf16.msra.mxu2 %v1159_v10  ;;  %475 = vmatpush.bf16.msrb.mxu0 %v1340_v33  ;;  %v1324_v56 = vor.u32 %v1620_v52, %v1323_v50  ;;  %v1245_v10 = vld [vmem:[#allocation2 + $0x138] sm:$0xf0]  ;;  %v1595_v33 = vld [vmem:[#allocation2 + $0x114] sm:$0xf]  ;;  %v1594_v42 = vld [vmem:[#allocation2 + $0x104] sm:$0xf0] }
  0x2a   :  { %464 = vmatpush.bf16.msra.mxu3 %v1252_v55  ;;  %v1248_v13 = vor.u32 %v1599_v8, %v1245_v10  ;;  %v1232_v36 = vor.u32 %v1595_v33, %v1229_v35  ;;  %v1655_v40 = vld [vmem:[%s1933_s4 + $0x30] sm:$0xff]  ;;  %v1593_v43 = vld [vmem:[#allocation2 + $0x104] sm:$0xf]  ;;  %v1612_v48 = vld [vmem:[#allocation2 + $0x194] sm:$0xf0] }
  0x2b   :  { %v1291_v47 = vld [vmem:[#allocation2 + $0x190] sm:$0xf]  ;;  %v1654_v50 = vld [vmem:[%s1933_s4 + $0x28] sm:$0xff]  ;;  %v1653_v54 = vld [vmem:[%s1933_s4 + $0x20] sm:$0xff] }
  0x2c   :  { %489 = vmatpush.bf16.msrb.mxu1 %v1280_v22  ;;  %v1237_v22 = vld [vmem:[#allocation2 + $0x128] sm:$0xf0]  ;;  %v1292_v49 = vor.u32 %v1612_v48, %v1291_v47  ;;  %v1610_v52 = vld [vmem:[#allocation2 + $0x184] sm:$0xf0]  ;;  %v1652_v55 = vld [vmem:[%s1933_s4 + $0x18] sm:$0xff] }
  0x2d   :  { %503 = vmatpush.bf16.msrb.mxu2 %v1344_v14  ;;  %476 = vmatpush.bf16.msrb.mxu0 %v1332_v45  ;;  %v1296_v14 = vor.u32 %v1611_v11, %v1293_v12  ;;  %v1240_v25 = vor.u32 %v1597_v20, %v1237_v22  ;;  %v1221_v45 = vld [vmem:[#allocation2 + $0x108] sm:$0xf0]  ;;  %v1151_v59 = vld [vmem:[%s1934_s5 + $0x10] ss:$8 sm:$0x3] }
  0x2e   :  { %465 = vmatpush.bf16.msra.mxu3 %v1244_v9  ;;  %v1224_v46 = vor.u32 %v1593_v43, %v1221_v45  ;;  %v1640_v8 = vld [vmem:[#allocation2 + $0x2f4] sm:$0xf0]  ;;  %v145_v9 = vperm.slane %v1151_v59, 1  ;;  %v1367_v11 = vld [vmem:[#allocation2 + $0x250] sm:$0xf]  ;;  %v763_v31 = vld [vmem:[%s1930_s1 + $0x8] sm:$0xff] }
  0x2f   :  { %v1630_v12 = vld [vmem:[#allocation2 + $0x254] sm:$0xf0]  ;;  %v1629_v20 = vld [vmem:[#allocation2 + $0x244] sm:$0xf0]  ;;  %v1403_v33 = vld [vmem:[#allocation2 + $0x2e0] sm:$0xf] }
  0x30   :  { %490 = vmatpush.bf16.msrb.mxu1 %v1272_v30  ;;  %v1656_v30 = vld [vmem:[%s1933_s4 + $0x38] sm:$0xff]  ;;  %v1368_v16 = vor.u32 %v1630_v12, %v1367_v11  ;;  %v1395_v45 = vld [vmem:[#allocation2 + $0x2c0] sm:$0xf] }
  0x31   :  { %504 = vmatpush.bf16.msrb.mxu2 %v1336_v21  ;;  %477 = vmatpush.bf16.msrb.mxu0 %v1324_v56  ;;  %v1236_v21 = vor.u32 %v1598_v19, %v1235_v18  ;;  %v1651_v56 = vld [vmem:[%s1933_s4 + $0x10] sm:$0xff]  ;;  %v1363_v19 = vld [vmem:[#allocation2 + $0x240] sm:$0xf]  ;;  %v1628_v27 = vld [vmem:[#allocation2 + $0x234] sm:$0xf0] }
  0x32   :  { %v1364_v23 = vor.u32 %v1629_v20, %v1363_v19  ;;  %v1626_v43 = vld [vmem:[#allocation2 + $0x214] sm:$0xf0]  ;;  %v1347_v48 = vld [vmem:[#allocation2 + $0x200] sm:$0xf] }
  0x33   :  { %466 = vmatpush.bf16.msra.mxu3 %v1236_v21 }
  0x34   :  { %491 = vmatpush.bf16.msrb.mxu1 %v1264_v44  ;;  %v1220_v44 = vor.u32 %v1594_v42, %v1219_v41  ;;  %v1351_v42 = vld [vmem:[#allocation2 + $0x210] sm:$0xf] }
  0x35   :  { %505 = vmatpush.bf16.msrb.mxu2 %v1328_v37  ;;  %478 = vmatpush.bf16.msrb.mxu0 %v1316_v17  ;;  %v1299_v37 = vld [vmem:[#allocation2 + $0x1a0] sm:$0xf] }
  0x36   :  { %v1300_v39 = vor.u32 %v1614_v38, %v1299_v37  ;;  %v1627_v37 = vld [vmem:[#allocation2 + $0x224] sm:$0xf0] }
  0x37   :  { %467 = vmatpush.bf16.msra.mxu3 %v1228_v34  ;;  %v1639_v34 = vld [vmem:[#allocation2 + $0x2e4] sm:$0xf0] }
  0x38   :  { %492 = vmatpush.bf16.msrb.mxu1 %v1256_v57  ;;  %v1650_v57 = vld [vmem:[%s1933_s4 + $0x8] sm:$0xff]  ;;  %v1404_v35 = vor.u32 %v1639_v34, %v1403_v33 }
  0x39   :  { %506 = vmatpush.bf16.msrb.mxu2 %v1320_v51  ;;  %479 = vmatpush.bf16.msrb.mxu0 %v1308_v29  ;;  %v1283_v51 = vld [vmem:[#allocation2 + $0x180] sm:$0xf] }
  0x3a   :  { %v1284_v53 = vor.u32 %v1610_v52, %v1283_v51  ;;  %v1391_v51 = vld [vmem:[#allocation2 + $0x2b0] sm:$0xf]  ;;  %v1636_v52 = vld [vmem:[#allocation2 + $0x2b4] sm:$0xf0] }
  0x3b   :  { %468 = vmatpush.bf16.msra.mxu3 %v1220_v44  ;;  %v1352_v44 = vor.u32 %v1626_v43, %v1351_v42  ;;  %v781_v42 = vld [vmem:[%s1934_s5 + $0x50] ss:$0 sm:$0xff] }
  0x3c   :  { %493 = vmatpush.bf16.msrb.mxu1 %v1248_v13 }
  0x3d   :  { %507 = vmatpush.bf16.msrb.mxu2 %v1312_v58  ;;  %480 = vmatpush.bf16.msrb.mxu0 %v1300_v39  ;;  %v1649_v58 = vld [vmem:[%s1933_s4] sm:$0xff]  ;;  %v1399_v39 = vld [vmem:[#allocation2 + $0x2d0] sm:$0xf] }
  0x40   :  { %494 = vmatpush.bf16.msrb.mxu1 %v1240_v25 }
  0x41   :  { %508 = vmatpush.bf16.msrb.mxu2 %v1304_v62  ;;  %481 = vmatpush.bf16.msrb.mxu0 %v1292_v49  ;;  %v1375_v62 = vld [vmem:[#allocation2 + $0x270] sm:$0xf]  ;;  %v1625_v49 = vld [vmem:[#allocation2 + $0x204] sm:$0xf0] }
  0x44   :  { %495 = vmatpush.bf16.msrb.mxu1 %v1232_v36  ;;  %v1355_v36 = vld [vmem:[#allocation2 + $0x220] sm:$0xf] }
  0x45   :  { %509 = vmatpush.bf16.msrb.mxu2 %v1296_v14  ;;  %482 = vmatpush.bf16.msrb.mxu0 %v1284_v53  ;;  %v1356_v38 = vor.u32 %v1627_v37, %v1355_v36  ;;  %v1392_v53 = vor.u32 %v1636_v52, %v1391_v51  ;;  %v1423_v52 = vld [vmem:[#allocation2 + $0x330] sm:$0xf] }
  0x48   :  { %496 = vmatpush.bf16.msrb.mxu1 %v1224_v46  ;;  %v1637_v46 = vld [vmem:[#allocation2 + $0x2c4] sm:$0xf0] }
  0x49   :  { %510 = vmatpush.bf16.msrb.mxu2 %v1288_v26  ;;  %v1359_v26 = vld [vmem:[#allocation2 + $0x230] sm:$0xf]  ;;  %v1396_v47 = vor.u32 %v1637_v46, %v1395_v45 }
  0x4a   :  { %v1360_v29 = vor.u32 %v1628_v27, %v1359_v26 }
  0xa5   :  { %v117_v61 = vpop.f32.mrf.mxu0 }
  0xa6   :  { %v118_v0 = vadd.f32 %v117_v61, %v59_v63  ;;  %v144_v61 = vperm.slane %v1151_v59, 0  ;;  %v1383_v59 = vld [vmem:[#allocation2 + $0x290] sm:$0xf] }
  0xa8   :  { %v122_v3 = vmax.f32 %v118_v0, 0.0  ;;  %v1371_v0 = vld [vmem:[#allocation2 + $0x260] sm:$0xf] }
  0xad   :  { %v119_v1 = vpop.f32.mrf.mxu0 }
  0xae   :  { %v120_v2 = vadd.f32 %v119_v1, %v59_v63  ;;  %v1632_v63 = vld [vmem:[#allocation2 + $0x274] sm:$0xf0] }
  0xb0   :  { %v123_v4 = vmax.f32 %v120_v2, 0.0  ;;  %v1376_v2 = vor.u32 %v1632_v63, %v1375_v62  ;;  %v1662_v62 = vld [vmem:[%s1933_s4 + $0x68] sm:$0xff]  ;;  %v1379_v63 = vld [vmem:[#allocation2 + $0x280] sm:$0xf] }
  0xb2   :  { %v140_v5 = vpack.c.bf16 %v123_v4, %v122_v3  ;;  %v1631_v3 = vld [vmem:[#allocation2 + $0x264] sm:$0xf0]  ;;  %652 = vmatpush.bf16.msrb.mxu3 %v1376_v2  ;;  %v1661_v2 = vld [vmem:[%s1933_s4 + $0x60] sm:$0xff] }
  0xb3   :  { %v1372_v7 = vor.u32 %v1631_v3, %v1371_v0  ;;  %v1633_v0 = vld [vmem:[#allocation2 + $0x284] sm:$0xf0]  ;;  %v1660_v3 = vld [vmem:[%s1933_s4 + $0x58] sm:$0xff] }
  0xb4   :  { %236 = vmatmul.bf16.vlgmr.msra.gmra.mxu1 %v140_v5  ;;  %250 = vmatmul.bf16.vlgmr.msra.gmra.mxu2 %v140_v5  ;;  %v1407_v5 = vld [vmem:[#allocation2 + $0x2f0] sm:$0xf] }
  0xb5   :  { %830 = vmatpush.bf16.msra.mxu2 %v1656_v30  ;;  %v1408_v13 = vor.u32 %v1640_v8, %v1407_v5  ;;  %v762_v30 = vld [vmem:[%s1930_s1] sm:$0xff]  ;;  %v1658_v5 = vld [vmem:[%s1933_s4 + $0x48] sm:$0xff] }
  0xb6   :  { %653 = vmatpush.bf16.msrb.mxu3 %v1372_v7  ;;  %v780_v32 = vpack.c.bf16 %v763_v31, %v762_v30  ;;  %v1216_v7 = vld [vmem:[%s1934_s5 + $0x20] ss:$8 sm:$0x3] }
  0xb7   :  { %666 = vmatpush.bf16.msra.mxu0 %v1408_v13  ;;  %v297_v11 = vperm.slane %v1216_v7, 0  ;;  %v1439_v13 = vld [vmem:[#allocation2 + $0x370] sm:$0xf]  ;;  %v298_v19 = vperm.slane %v1216_v7, 1  ;;  %v1665_v7 = vld [vmem:[%s1933_s4 + $0x80] sm:$0xff] }
  0xb9   :  { %831 = vmatpush.bf16.msra.mxu2 %v1655_v40  ;;  %v1638_v40 = vld [vmem:[#allocation2 + $0x2d4] sm:$0xf0] }
  0xba   :  { %654 = vmatpush.bf16.msrb.mxu3 %v1368_v16  ;;  %v1400_v41 = vor.u32 %v1638_v40, %v1399_v39 }
  0xbb   :  { %667 = vmatpush.bf16.msra.mxu0 %v1404_v35 }
  0xbd   :  { %832 = vmatpush.bf16.msra.mxu2 %v1654_v50  ;;  %v1348_v50 = vor.u32 %v1625_v49, %v1347_v48  ;;  %v1427_v49 = vld [vmem:[#allocation2 + $0x340] sm:$0xf] }
  0xbe   :  { %655 = vmatpush.bf16.msrb.mxu3 %v1364_v23 }
  0xbf   :  { %668 = vmatpush.bf16.msra.mxu0 %v1400_v41 }
  0xc1   :  { %833 = vmatpush.bf16.msra.mxu2 %v1653_v54  ;;  %v1664_v54 = vld [vmem:[%s1933_s4 + $0x78] sm:$0xff] }
  0xc2   :  { %656 = vmatpush.bf16.msrb.mxu3 %v1360_v29 }
  0xc3   :  { %669 = vmatpush.bf16.msra.mxu0 %v1396_v47 }
  0xc5   :  { %834 = vmatpush.bf16.msra.mxu2 %v1652_v55  ;;  %v1387_v55 = vld [vmem:[#allocation2 + $0x2a0] sm:$0xf] }
  0xc6   :  { %657 = vmatpush.bf16.msrb.mxu3 %v1356_v38 }
  0xc7   :  { %670 = vmatpush.bf16.msra.mxu0 %v1392_v53  ;;  %v1644_v53 = vld [vmem:[#allocation2 + $0x334] sm:$0xf0] }
  0xc9   :  { %835 = vmatpush.bf16.msra.mxu2 %v1651_v56  ;;  %v1635_v56 = vld [vmem:[#allocation2 + $0x2a4] sm:$0xf0] }
  0xca   :  { %658 = vmatpush.bf16.msrb.mxu3 %v1352_v44 }
  0xcd   :  { %836 = vmatpush.bf16.msra.mxu2 %v1650_v57  ;;  %v1388_v57 = vor.u32 %v1635_v56, %v1387_v55  ;;  %v1672_v55 = vld [vmem:[%s1933_s4 + $0xb8] sm:$0xff]  ;;  %v1419_v56 = vld [vmem:[#allocation2 + $0x320] sm:$0xf] }
  0xce   :  { %659 = vmatpush.bf16.msrb.mxu3 %v1348_v50  ;;  %v1645_v50 = vld [vmem:[#allocation2 + $0x344] sm:$0xf0] }
  0xcf   :  { %671 = vmatpush.bf16.msra.mxu0 %v1388_v57  ;;  %v1428_v51 = vor.u32 %v1645_v50, %v1427_v49  ;;  %v1643_v57 = vld [vmem:[#allocation2 + $0x324] sm:$0xf0] }
  0xd1   :  { %837 = vmatpush.bf16.msra.mxu2 %v1649_v58  ;;  %v1663_v58 = vld [vmem:[%s1933_s4 + $0x70] sm:$0xff] }
 0x131   :  { %v237_v60 = vpop.f32.mrf.mxu1 }
 0x132   :  { %v238_v4 = vadd.f32 %v237_v60, %v144_v61  ;;  %v1634_v60 = vld [vmem:[#allocation2 + $0x294] sm:$0xf0] }
 0x134   :  { %v256_v14 = vmax.f32 %v238_v4, 0.0  ;;  %v1659_v4 = vld [vmem:[%s1933_s4 + $0x50] sm:$0xff] }
 0x137   :  { %v251_v1 = vpop.f32.mrf.mxu2 }
 0x138   :  { %v252_v17 = vadd.f32 %v251_v1, %v145_v9  ;;  %v1380_v1 = vor.u32 %v1633_v0, %v1379_v63  ;;  %v1670_v63 = vld [vmem:[%s1933_s4 + $0xa8] sm:$0xff]  ;;  %v1411_v0 = vld [vmem:[#allocation2 + $0x300] sm:$0xf] }
 0x139   :  { %v239_v6 = vpop.f32.mrf.mxu1 }
 0x13a   :  { %v240_v10 = vadd.f32 %v239_v6, %v144_v61  ;;  %v257_v24 = vmax.f32 %v252_v17, 0.0  ;;  %v1384_v61 = vor.u32 %v1634_v60, %v1383_v59  ;;  %v1435_v17 = vld [vmem:[#allocation2 + $0x360] sm:$0xf]  ;;  %v1671_v59 = vld [vmem:[%s1933_s4 + $0xb0] sm:$0xff] }
 0x13b   :  { %v1415_v60 = vld [vmem:[#allocation2 + $0x310] sm:$0xf] }
 0x13c   :  { %v258_v15 = vmax.f32 %v240_v10, 0.0  ;;  %672 = vmatpush.bf16.msra.mxu0 %v1384_v61  ;;  %v1657_v10 = vld [vmem:[%s1933_s4 + $0x40] sm:$0xff]  ;;  %v1642_v61 = vld [vmem:[#allocation2 + $0x314] sm:$0xf0] }
 0x13e   :  { %v292_v18 = vpack.c.bf16 %v258_v15, %v256_v14  ;;  %v1648_v14 = vld [vmem:[#allocation2 + $0x374] sm:$0xf0] }
 0x13f   :  { %v253_v21 = vpop.f32.mrf.mxu2  ;;  %v1440_v16 = vor.u32 %v1648_v14, %v1439_v13 }
 0x140   :  { %v254_v22 = vadd.f32 %v253_v21, %v145_v9  ;;  %469 = vmatmul.bf16.vlgmr.msra.gmra.mxu3 %v292_v18  ;;  %497 = vmatmul.bf16.vlgmr.msrb.gmra.mxu1 %v292_v18  ;;  %v1647_v18 = vld [vmem:[#allocation2 + $0x364] sm:$0xf0] }
 0x141   :  { %912 = vmatpush.bf16.msra.mxu3 %v1664_v54  ;;  %673 = vmatpush.bf16.msra.mxu0 %v1380_v1  ;;  %v1436_v21 = vor.u32 %v1647_v18, %v1435_v17  ;;  %v1424_v54 = vor.u32 %v1644_v53, %v1423_v52  ;;  %v1641_v1 = vld [vmem:[#allocation2 + $0x304] sm:$0xf0] }
 0x142   :  { %v259_v25 = vmax.f32 %v254_v22, 0.0  ;;  %748 = vmatpush.bf16.msra.mxu1 %v1440_v16 }
 0x144   :  { %v293_v28 = vpack.c.bf16 %v259_v25, %v257_v24  ;;  %v1431_v24 = vld [vmem:[#allocation2 + $0x350] sm:$0xf]  ;;  %v1646_v25 = vld [vmem:[#allocation2 + $0x354] sm:$0xf0] }
 0x145   :  { %913 = vmatpush.bf16.msra.mxu3 %v1663_v58  ;;  %v1432_v30 = vor.u32 %v1646_v25, %v1431_v24  ;;  %v1420_v58 = vor.u32 %v1643_v57, %v1419_v56 }
 0x146   :  { %483 = vmatmul.bf16.vlgmr.msrb.gmra.mxu0 %v293_v28  ;;  %511 = vmatmul.bf16.vlgmr.msrb.gmra.mxu2 %v293_v28 }
 0x147   :  { %749 = vmatpush.bf16.msra.mxu1 %v1436_v21  ;;  %994 = vmatpush.bf16.msrb.mxu0 %v1672_v55  ;;  %v863_v21 = vld [vmem:[%s1934_s5 + $0x60] ss:$0 sm:$0xff]  ;;  %v1093_v55 = vld [vmem:[%s1931_s2 + $0x8] sm:$0xff] }
 0x149   :  { %914 = vmatpush.bf16.msra.mxu3 %v1662_v62  ;;  %v1416_v62 = vor.u32 %v1642_v61, %v1415_v60 }
 0x14b   :  { %750 = vmatpush.bf16.msra.mxu1 %v1432_v30  ;;  %995 = vmatpush.bf16.msrb.mxu0 %v1671_v59  ;;  %v1678_v30 = vld [vmem:[%s1933_s4 + $0xe8] sm:$0xff]  ;;  %v1095_v59 = vmul.f32 0.1, %v1093_v55 }
 0x14d   :  { %915 = vmatpush.bf16.msra.mxu3 %v1661_v2  ;;  %v1412_v2 = vor.u32 %v1641_v1, %v1411_v0 }
 0x14f   :  { %751 = vmatpush.bf16.msra.mxu1 %v1428_v51  ;;  %996 = vmatpush.bf16.msrb.mxu0 %v1670_v63 }
 0x151   :  { %916 = vmatpush.bf16.msra.mxu3 %v1660_v3  ;;  %v1669_v3 = vld [vmem:[%s1933_s4 + $0xa0] sm:$0xff] }
 0x153   :  { %752 = vmatpush.bf16.msra.mxu1 %v1424_v54  ;;  %997 = vmatpush.bf16.msrb.mxu0 %v1669_v3 }
 0x155   :  { %917 = vmatpush.bf16.msra.mxu3 %v1659_v4  ;;  %v1668_v4 = vld [vmem:[%s1933_s4 + $0x98] sm:$0xff] }
 0x156   :  { %838 = vmatmul.bf16.vlgmr.msra.gmra.mxu2 %v780_v32 }
 0x157   :  { %753 = vmatpush.bf16.msra.mxu1 %v1420_v58  ;;  %998 = vmatpush.bf16.msrb.mxu0 %v1668_v4 }
 0x159   :  { %918 = vmatpush.bf16.msra.mxu3 %v1658_v5  ;;  %v1667_v5 = vld [vmem:[%s1933_s4 + $0x90] sm:$0xff] }
 0x15b   :  { %754 = vmatpush.bf16.msra.mxu1 %v1416_v62  ;;  %999 = vmatpush.bf16.msrb.mxu0 %v1667_v5 }
 0x15d   :  { %919 = vmatpush.bf16.msra.mxu3 %v1657_v10  ;;  %v555_v10 = vld [vmem:[%s1934_s5 + $0x30] ss:$0 sm:$0xff] }
 0x15f   :  { %755 = vmatpush.bf16.msra.mxu1 %v1412_v2 }
 0x1bd   :  { %v498_v6 = vpop.f32.mrf.mxu1 }
 0x1be   :  { %v499_v28 = vadd.f32 %v498_v6, %v298_v19  ;;  %v1666_v6 = vld [vmem:[%s1933_s4 + $0x88] sm:$0xff] }
 0x1bf   :  { %1000 = vmatpush.bf16.msrb.mxu0 %v1666_v6 }
 0x1c3   :  { %v470_v8 = vpop.f32.mrf.mxu3  ;;  %v484_v9 = vpop.f32.mrf.mxu0  ;;  %1001 = vmatpush.bf16.msrb.mxu0 %v1665_v7 }
 0x1c4   :  { %v471_v12 = vadd.f32 %v470_v8, %v297_v11 }
 0x1c5   :  { %v500_v26 = vpop.f32.mrf.mxu1 }
 0x1c6   :  { %v485_v22 = vadd.f32 %v484_v9, %v471_v12  ;;  %v501_v32 = vadd.f32 %v500_v26, %v298_v19 }
 0x1c8   :  { %v517_v31 = vmax.f32 %v485_v22, 0.0 }
 0x1c9   :  { %v512_v15 = vpop.f32.mrf.mxu2 }
 0x1ca   :  { %v513_v33 = vadd.f32 %v512_v15, %v499_v28  ;;  %v1680_v28 = vld [vmem:[%s1933_s4 + $0xf8] sm:$0xff] }
 0x1cb   :  { %v472_v20 = vpop.f32.mrf.mxu3  ;;  %v486_v27 = vpop.f32.mrf.mxu0  ;;  %1076 = vmatpush.bf16.msrb.mxu1 %v1680_v28 }
 0x1cc   :  { %v473_v23 = vadd.f32 %v472_v20, %v297_v11  ;;  %v518_v38 = vmax.f32 %v513_v33, 0.0  ;;  %v1675_v33 = vld [vmem:[%s1933_s4 + $0xd0] sm:$0xff] }
 0x1ce   :  { %v487_v29 = vadd.f32 %v486_v27, %v473_v23 }
 0x1d0   :  { %v519_v34 = vmax.f32 %v487_v29, 0.0  ;;  %v1679_v29 = vld [vmem:[%s1933_s4 + $0xf0] sm:$0xff] }
 0x1d1   :  { %v514_v35 = vpop.f32.mrf.mxu2  ;;  %1077 = vmatpush.bf16.msrb.mxu1 %v1679_v29 }
 0x1d2   :  { %v553_v36 = vpack.c.bf16 %v519_v34, %v517_v31  ;;  %v515_v37 = vadd.f32 %v514_v35, %v501_v32  ;;  %v1677_v31 = vld [vmem:[%s1933_s4 + $0xe0] sm:$0xff]  ;;  %v1676_v32 = vld [vmem:[%s1933_s4 + $0xd8] sm:$0xff]  ;;  %v1674_v34 = vld [vmem:[%s1933_s4 + $0xc8] sm:$0xff] }
 0x1d3   :  { %v1673_v35 = vld [vmem:[%s1933_s4 + $0xc0] sm:$0xff] }
 0x1d4   :  { %v520_v39 = vmax.f32 %v515_v37, 0.0  ;;  %660 = vmatmul.bf16.vlgmr.msrb.gmra.mxu3 %v553_v36  ;;  %v945_v37 = vld [vmem:[%s1934_s5 + $0x70] ss:$0 sm:$0xff] }
 0x1d5   :  { %1078 = vmatpush.bf16.msrb.mxu1 %v1678_v30 }
 0x1d6   :  { %v554_v40 = vpack.c.bf16 %v520_v39, %v518_v38 }
 0x1d8   :  { %674 = vmatmul.bf16.vlgmr.msra.gmra.mxu0 %v554_v40 }
 0x1d9   :  { %v839_v41 = vpop.f32.mrf.mxu2  ;;  %1079 = vmatpush.bf16.msrb.mxu1 %v1677_v31 }
 0x1da   :  { %v840_v43 = vadd.f32 %v839_v41, %v781_v42 }
 0x1dc   :  { %v844_v46 = vmax.f32 %v840_v43, 0.0 }
 0x1dd   :  { %1080 = vmatpush.bf16.msrb.mxu1 %v1676_v32 }
 0x1e1   :  { %v841_v44 = vpop.f32.mrf.mxu2  ;;  %1081 = vmatpush.bf16.msrb.mxu1 %v1675_v33 }
 0x1e2   :  { %v842_v45 = vadd.f32 %v841_v44, %v781_v42 }
 0x1e4   :  { %v845_v47 = vmax.f32 %v842_v45, 0.0 }
 0x1e5   :  { %1082 = vmatpush.bf16.msrb.mxu1 %v1674_v34 }
 0x1e6   :  { %v862_v48 = vpack.c.bf16 %v845_v47, %v844_v46  ;;  %v699_v46 = vld [vmem:[%s1934_s5 + $0x40] ss:$0 sm:$0xff] }
 0x1e7   :  { %v1027_v47 = vld [vmem:[%s1934_s5 + $0x80] ss:$0 sm:$0xff]  ;;  %s1740_s5 = smov [#allocation5]  }
 0x1e8   :  { %920 = vmatmul.bf16.vlgmr.msra.gmra.mxu3 %v862_v48  ;;  %v1092_v48 = vld [vmem:[%s1931_s2] sm:$0xff]  ;;  %s1104_s20 = sshll.u32 %s1740_s5, 4  ;;  %s1105_s20 = int_to_ptr.vmem [resolvable:$true] %s1104_s20 }
 0x1e9   :  { %1083 = vmatpush.bf16.msrb.mxu1 %v1673_v35  ;;  %v1094_v52 = vmul.f32 0.1, %v1092_v48 }
 0x255   :  { %v675_v8 = vpop.f32.mrf.mxu0 }
 0x257   :  { %v661_v9 = vpop.f32.mrf.mxu3 }
 0x258   :  { %v662_v11 = vadd.f32 %v661_v9, %v555_v10 }
 0x25a   :  { %v676_v13 = vadd.f32 %v675_v8, %v662_v11 }
 0x25c   :  { %v680_v17 = vmax.f32 %v676_v13, 0.0 }
 0x25d   :  { %v677_v15 = vpop.f32.mrf.mxu0 }
 0x25f   :  { %v663_v12 = vpop.f32.mrf.mxu3 }
 0x260   :  { %v664_v14 = vadd.f32 %v663_v12, %v555_v10 }
 0x262   :  { %v678_v16 = vadd.f32 %v677_v15, %v664_v14 }
 0x264   :  { %v681_v18 = vmax.f32 %v678_v16, 0.0 }
 0x266   :  { %v698_v19 = vpack.c.bf16 %v681_v18, %v680_v17 }
 0x268   :  { %756 = vmatmul.bf16.vlgmr.msra.gmra.mxu1 %v698_v19 }
 0x26b   :  { %v921_v20 = vpop.f32.mrf.mxu3 }
 0x26c   :  { %v922_v22 = vadd.f32 %v921_v20, %v863_v21 }
 0x26e   :  { %v926_v25 = vmax.f32 %v922_v22, 0.0 }
 0x273   :  { %v923_v23 = vpop.f32.mrf.mxu3 }
 0x274   :  { %v924_v24 = vadd.f32 %v923_v23, %v863_v21 }
 0x276   :  { %v927_v26 = vmax.f32 %v924_v24, 0.0 }
 0x278   :  { %v944_v27 = vpack.c.bf16 %v927_v26, %v926_v25 }
 0x27a   :  { %1002 = vmatmul.bf16.vlgmr.msrb.gmra.mxu0 %v944_v27 }
 0x2e5   :  { %v757_v44 = vpop.f32.mrf.mxu1 }
 0x2e6   :  { %v758_v50 = vadd.f32 %v757_v44, %v699_v46 }
 0x2ed   :  { %v759_v45 = vpop.f32.mrf.mxu1 }
 0x2ee   :  { %v760_v57 = vadd.f32 %v759_v45, %v699_v46 }
 0x2f7   :  { %v1003_v36 = vpop.f32.mrf.mxu0 }
 0x2f8   :  { %v1004_v38 = vadd.f32 %v1003_v36, %v945_v37 }
 0x2fa   :  { %v1008_v41 = vmax.f32 %v1004_v38, 0.0 }
 0x2ff   :  { %v1005_v39 = vpop.f32.mrf.mxu0 }
 0x300   :  { %v1006_v40 = vadd.f32 %v1005_v39, %v945_v37 }
 0x302   :  { %v1009_v42 = vmax.f32 %v1006_v40, 0.0 }
 0x304   :  { %v1026_v43 = vpack.c.bf16 %v1009_v42, %v1008_v41 }
 0x306   :  { %1084 = vmatmul.bf16.vlgmr.msrb.gmra.mxu1 %v1026_v43 }
 0x383   :  { %v1085_v49 = vpop.f32.mrf.mxu1 }
 0x384   :  { %v1086_v51 = vadd.f32 %v1085_v49, %v1027_v47 }
 0x386   :  { %v1090_v53 = vadd.f32 %v1086_v51, %v758_v50 }
 0x388   :  { %v1096_v54 = vsub.f32 %v1090_v53, %v1094_v52 }
 0x38a   :  { %1098 = vst [vmem:[#allocation5] sm:$0xff] %v1096_v54 }
 0x38b   :  { %v1087_v56 = vpop.f32.mrf.mxu1 }
 0x38c   :  { %v1088_v58 = vadd.f32 %v1087_v56, %v1027_v47 }
 0x38e   :  { %v1091_v60 = vadd.f32 %v1088_v58, %v760_v57 }
 0x390   :  { %v1097_v61 = vsub.f32 %v1091_v60, %v1095_v59 }
 0x392   :  { %1099 = vst [vmem:[#allocation5 + $0x8] sm:$0xff] %v1097_v61 }
 0x393   :  { %1112 = dma.vmem_to_hbm [thread:$0]  %s1105_s20, 256, %s1107_s23, [#allocation4], %s1738_s26, %s1738_s26, %s1739_s27  }
 0x394   :  { %1735 = dma.done.wait [#allocation4], 256  }
 0x395   :  { %1736 = vsyncadd [#allocation4], 4294967040 }
 0x396   :  { %1117 = vsyncpa [#allocation3], 1 }
 0x397   :  { %1118 = vsyncpa [#allocation4], 1 }

</bundles_post_ra>
